<compile_context>
chip_gen: v7x
topology: tpu7x:2x2x1
jax: 0.10.0
libtpu: 0.0.40
codegen_flags: <defaults>
</compile_context>

<pallas_src>
import jax
import jax.numpy as jnp
from jax import lax
from jax.experimental import pallas as pl
from jax.experimental.pallas import tpu as pltpu


# ---------------------------------------------------------------------------
# Kernels
# ---------------------------------------------------------------------------
def _gcn_kernel(x_ref, w_ref, o_ref):
    # x_ref: (1, 1, N, F) nodes of one (batch, window) point; w_ref: (1, F, O).
    x = x_ref[0, 0]                                               # (N, F)
    n = x.shape[0]

    # --- adjacency from node features ---
    # TODO(synk): knn_value() is not defined in the provided spec; using
    # adj[i, j] = exp(-||x_i - x_j||^2) (Gaussian kernel) as a stand-in.
    g = lax.dot_general(x, x, (((1,), (1,)), ((), ())),
                        preferred_element_type=jnp.float32)       # (N, N) gram
    row = lax.broadcasted_iota(jnp.int32, (n, n), 0)
    col = lax.broadcasted_iota(jnp.int32, (n, n), 1)
    eye = (row == col).astype(jnp.float32)
    sq_col = jnp.sum(g * eye, axis=-1, keepdims=True)             # (N, 1) ||x_i||^2
    sq_row = jnp.sum(g * eye, axis=-2, keepdims=True)             # (1, N)
    d2 = sq_col + sq_row - 2.0 * g
    adj = jnp.exp(-d2)

    # --- adj + I, symmetric normalization D^-1/2 (A+I) D^-1/2 ---
    adjs = adj + eye
    deg_r = jnp.sum(adjs, axis=-1, keepdims=True)                 # (N, 1)
    deg_c = jnp.sum(adjs, axis=-2, keepdims=True)                 # (1, N) (symmetric)
    a_norm = lax.rsqrt(deg_r) * adjs * lax.rsqrt(deg_c)

    # --- GCN: A_norm @ X @ W_w (two MXU matmuls, f32 accumulation) ---
    h = jnp.dot(a_norm, x, preferred_element_type=jnp.float32)    # (N, F)
    out = jnp.dot(h, w_ref[0], preferred_element_type=jnp.float32)  # (N, O)
    o_ref[0, 0] = out.astype(o_ref.dtype)


def _lstm_kernel(x_ref, wih_ref, whh_ref, b_ref, o_ref, h_scr, c_scr):
    # x_ref: (1, TILE_B, D) one timestep; weights (4, D, H) / (4, H, H) / (4, 1, H)
    # in PyTorch gate order [i, f, g, o]; bias already = b_ih + b_hh.
    w = pl.program_id(1)

    @pl.when(w == 0)
    def _():
        h_scr[...] = jnp.zeros_like(h_scr)
        c_scr[...] = jnp.zeros_like(c_scr)

    x = x_ref[0]                    # (TILE_B, D)
    h = h_scr[...]
    c = c_scr[...]

    def gate(k):
        return (jnp.dot(x, wih_ref[k], preferred_element_type=jnp.float32)
                + jnp.dot(h, whh_ref[k], preferred_element_type=jnp.float32)
                + b_ref[k])

    i_g = jax.nn.sigmoid(gate(0))
    f_g = jax.nn.sigmoid(gate(1))
    g_g = jnp.tanh(gate(2))
    o_g = jax.nn.sigmoid(gate(3))

    c_new = f_g * c + i_g * g_g
    h_new = o_g * jnp.tanh(c_new)
    h_scr[...] = h_new
    c_scr[...] = c_new

    @pl.when(w == pl.num_programs(1) - 1)
    def _():
        o_ref[...] = h_new.astype(o_ref.dtype)   # only the last hidden state


def _ffn_kernel(x_ref, w_ref, b_ref, o_ref):
    # Linear + Sigmoid head, lane-dense (128-multiple) padded output slab.
    y = jnp.dot(x_ref[...], w_ref[...], preferred_element_type=jnp.float32)
    o_ref[...] = jax.nn.sigmoid(y + b_ref[...]).astype(o_ref.dtype)


# ---------------------------------------------------------------------------
# Wrapper
# ---------------------------------------------------------------------------
def _pick_tile_b(b):
    # batch tile: a multiple of 8 that divides B, else the full batch.
    for t in (512, 256, 128, 64, 32, 16, 8):
        if b % t == 0:
            return t
    return b


@jax.jit
def generator_forward(nodes, params):
    """nodes: (B, W, in_features, node_num) f32 -> (B, node_num*in_features) f32."""
    w_gcn = params["w_gcn"]        # (W, F, O)
    w_ih = params["w_ih"]          # (4, D, H), D = O * node_num
    w_hh = params["w_hh"]          # (4, H, H)
    b_lstm = params["b_lstm"]      # (4, 1, H)  (= b_ih + b_hh)
    w_ffn = params["w_ffn"]        # (H, node_num*in_features)
    b_ffn = params["b_ffn"]        # (1, node_num*in_features)

    B, W, F, N = nodes.shape
    O = w_gcn.shape[-1]
    D = N * O
    H = w_hh.shape[-1]
    out_dim = w_ffn.shape[-1]

    x = jnp.transpose(nodes, (0, 1, 3, 2))          # (B, W, N, F)

    # ---- 1. adjacency + GCN, gridded over (batch, window), both "parallel" ----
    gcn_out = pl.pallas_call(
        _gcn_kernel,
        out_shape=jax.ShapeDtypeStruct((B, W, N, O), jnp.float32),
        grid_spec=pltpu.PrefetchScalarGridSpec(
            num_scalar_prefetch=0,
            grid=(B, W),
            in_specs=[
                pl.BlockSpec((1, 1, N, F), lambda b, w: (b, w, 0, 0)),
                pl.BlockSpec((1, F, O), lambda b, w: (w, 0, 0)),
            ],
            out_specs=pl.BlockSpec((1, 1, N, O), lambda b, w: (b, w, 0, 0)),
        ),
        compiler_params=pltpu.CompilerParams(
            dimension_semantics=("parallel", "parallel")),
        cost_estimate=pl.CostEstimate(
            flops=int(B * W * (4 * N * N * F + 2 * N * F * O)),
            transcendentals=int(B * W * (N * N + 2 * N)),
            bytes_accessed=int(4 * (B * W * N * F + W * F * O + B * W * N * O))),
    )(x, w_gcn)

    # ---- 2. LSTM over the window axis (time-major input, h/c in VMEM scratch) ----
    seq = jnp.transpose(gcn_out.reshape(B, W, D), (1, 0, 2))      # (W, B, D)
    tile_b = _pick_tile_b(B)
    h_last = pl.pallas_call(
        _lstm_kernel,
        out_shape=jax.ShapeDtypeStruct((B, H), jnp.float32),
        grid_spec=pltpu.PrefetchScalarGridSpec(
            num_scalar_prefetch=0,
            grid=(B // tile_b, W),
            in_specs=[
                pl.BlockSpec((1, tile_b, D), lambda bt, w: (w, bt, 0)),
                pl.BlockSpec((4, D, H), lambda bt, w: (0, 0, 0)),
                pl.BlockSpec((4, H, H), lambda bt, w: (0, 0, 0)),
                pl.BlockSpec((4, 1, H), lambda bt, w: (0, 0, 0)),
            ],
            out_specs=pl.BlockSpec((tile_b, H), lambda bt, w: (bt, 0)),
            scratch_shapes=[pltpu.VMEM((tile_b, H), jnp.float32),
                            pltpu.VMEM((tile_b, H), jnp.float32)],
        ),
        compiler_params=pltpu.CompilerParams(
            dimension_semantics=("parallel", "arbitrary")),
        cost_estimate=pl.CostEstimate(
            flops=int(8 * B * W * (D * H + H * H)),
            transcendentals=int(5 * B * W * H),
            bytes_accessed=int(4 * (B * W * D + 4 * (D * H + H * H + H) + B * H))),
    )(seq, w_ih, w_hh, b_lstm)

    # ---- 3. FFN head: Linear + Sigmoid with a lane-dense, zero-padded output ----
    out_pad = ((out_dim + 127) // 128) * 128
    w_ffn_p = jnp.pad(w_ffn, ((0, 0), (0, out_pad - out_dim)))    # zero columns
    b_ffn_p = jnp.pad(b_ffn, ((0, 0), (0, out_pad - out_dim)))
    ffn_out = pl.pallas_call(
        _ffn_kernel,
        out_shape=jax.ShapeDtypeStruct((B, out_pad), jnp.float32),
        grid_spec=pltpu.PrefetchScalarGridSpec(
            num_scalar_prefetch=0,
            grid=(B // tile_b,),
            in_specs=[
                pl.BlockSpec((tile_b, H), lambda bt: (bt, 0)),
                pl.BlockSpec((H, out_pad), lambda bt: (0, 0)),
                pl.BlockSpec((1, out_pad), lambda bt: (0, 0)),
            ],
            out_specs=pl.BlockSpec((tile_b, out_pad), lambda bt: (bt, 0)),
        ),
        compiler_params=pltpu.CompilerParams(
            dimension_semantics=("parallel",)),
        cost_estimate=pl.CostEstimate(
            flops=int(2 * B * H * out_pad),
            transcendentals=int(B * out_pad),
            bytes_accessed=int(4 * (B * H + H * out_pad + out_pad + B * out_pad))),
    )(h_last, w_ffn_p, b_ffn_p)

    return ffn_out[:, :out_dim]    # drop padded lanes; padded logits never leak


# ---------------------------------------------------------------------------
# Parameter init (mirrors the PyTorch module's shapes / init)
# ---------------------------------------------------------------------------
def init_generator_params(key, window_size, node_num, in_features, out_features,
                          lstm_features):
    ks = jax.random.split(key, 6)
    d_in = out_features * node_num
    out_dim = node_num * in_features

    gcn_bound = float(jnp.sqrt(6.0 / (in_features + out_features)))   # xavier_uniform
    w_gcn = jax.random.uniform(ks[0], (window_size, in_features, out_features),
                               jnp.float32, -gcn_bound, gcn_bound)

    lstm_bound = float(1.0 / jnp.sqrt(jnp.float32(lstm_features)))
    w_ih = jax.random.uniform(ks[1], (4, d_in, lstm_features), jnp.float32,
                              -lstm_bound, lstm_bound)
    w_hh = jax.random.uniform(ks[2], (4, lstm_features, lstm_features), jnp.float32,
                              -lstm_bound, lstm_bound)
    b_lstm = jax.random.uniform(ks[3], (4, 1, lstm_features), jnp.float32,
                                -2 * lstm_bound, 2 * lstm_bound)   # b_ih + b_hh combined

    w_ffn = jax.random.uniform(ks[4], (lstm_features, out_dim), jnp.float32,
                               -lstm_bound, lstm_bound)
    b_ffn = jax.random.uniform(ks[5], (1, out_dim), jnp.float32,
                               -lstm_bound, lstm_bound)

    return dict(w_gcn=w_gcn, w_ih=w_ih, w_hh=w_hh, b_lstm=b_lstm,
                w_ffn=w_ffn, b_ffn=b_ffn)


# ---------------------------------------------------------------------------
# Pure-JAX reference (same math, same knn_value stand-in)
# ---------------------------------------------------------------------------
def _reference_forward(nodes, params):
    hi = lax.Precision.HIGHEST
    w_gcn, w_ih, w_hh = params["w_gcn"], params["w_ih"], params["w_hh"]
    b_lstm, w_ffn, b_ffn = params["b_lstm"], params["w_ffn"], params["b_ffn"]
    B, W, F, N = nodes.shape
    H = w_hh.shape[-1]

    x = jnp.transpose(nodes, (0, 1, 3, 2))                       # (B, W, N, F)
    g = jnp.einsum("bwnf,bwmf->bwnm", x, x, precision=hi)
    eye = jnp.eye(N, dtype=jnp.float32)
    sq_col = jnp.sum(g * eye, axis=-1, keepdims=True)
    sq_row = jnp.sum(g * eye, axis=-2, keepdims=True)
    adj = jnp.exp(-(sq_col + sq_row - 2.0 * g))
    adjs = adj + eye
    a_norm = (lax.rsqrt(jnp.sum(adjs, -1, keepdims=True)) * adjs *
              lax.rsqrt(jnp.sum(adjs, -2, keepdims=True)))
    gcn = jnp.einsum("bwnm,bwmf->bwnf", a_norm, x, precision=hi)
    gcn = jnp.einsum("bwnf,wfo->bwno", gcn, w_gcn, precision=hi)
    seq = gcn.reshape(B, W, -1)

    def step(carry, x_t):
        h, c = carry

        def gate(k):
            return (jnp.dot(x_t, w_ih[k], precision=hi)
                    + jnp.dot(h, w_hh[k], precision=hi) + b_lstm[k])

        i = jax.nn.sigmoid(gate(0))
        f = jax.nn.sigmoid(gate(1))
        gg = jnp.tanh(gate(2))
        o = jax.nn.sigmoid(gate(3))
        c = f * c + i * gg
        h = o * jnp.tanh(c)
        return (h, c), None

    zeros = jnp.zeros((B, H), jnp.float32)
    (h, _), _ = lax.scan(step, (zeros, zeros), jnp.swapaxes(seq, 0, 1))
    return jax.nn.sigmoid(jnp.dot(h, w_ffn, precision=hi) + b_ffn)


# ---------------------------------------------------------------------------
if __name__ == "__main__":
    key = jax.random.PRNGKey(0)
    k_nodes, k_params = jax.random.split(key)

    batch, window, node_num = 2, 4, 8
    in_features, out_features, lstm_features = 4, 8, 32

    nodes = jax.random.normal(k_nodes, (batch, window, in_features, node_num),
                              dtype=jnp.float32)
    params = init_generator_params(k_params, window, node_num, in_features,
                                   out_features, lstm_features)

    out = generator_forward(nodes, params)
    out = jax.block_until_ready(out)

    ref = _reference_forward(nodes, params)
    assert out.shape == (batch, node_num * in_features), out.shape
    assert jnp.allclose(out, ref, atol=1e-4, rtol=1e-4), "mismatch vs reference"

    print("KERNEL_OK")
</pallas_src>

<mosaic_0001>
module attributes {stable_mosaic.version = 11 : i64} {
  func.func @_gcn_kernel(%arg0: i32, %arg1: i32, %arg2: memref<1x1x8x4xf32, #tpu.memory_space<vmem>>, %arg3: memref<1x4x8xf32, #tpu.memory_space<vmem>>, %arg4: memref<1x1x8x8xf32, #tpu.memory_space<vmem>>) attributes {dimension_semantics = [#tpu.dimension_semantics<parallel>, #tpu.dimension_semantics<parallel>], iteration_bounds = array<i64: 2, 4>, scalar_prefetch = 0 : i64, scratch_operands = 0 : i64, tpu.core_type = #tpu.core_type<tc>, window_params = [{transform_indices = @transform_0, window_bounds = array<i64: 1, 1, 8, 4>}, {transform_indices = @transform_1, window_bounds = array<i64: 1, 4, 8>}, {transform_indices = @transform_2, window_bounds = array<i64: 1, 1, 8, 8>}]} {
    %c0 = arith.constant 0 : index
    %c0_0 = arith.constant 0 : index
    %c0_1 = arith.constant 0 : index
    %c0_2 = arith.constant 0 : index
    %0 = vector.load %arg2[%c0, %c0_0, %c0_1, %c0_2] : memref<1x1x8x4xf32, #tpu.memory_space<vmem>>, vector<1x1x8x4xf32>
    %1 = vector.shape_cast %0 : vector<1x1x8x4xf32> to vector<8x4xf32>
    %cst = arith.constant dense<0.000000e+00> : vector<8x8xf32>
    %2 = tpu.matmul %1, %1, %cst {dimension_numbers = #tpu.dot_dimension_numbers<[1], [1], [0], [0], [0, 0, 1, 0], [], []>} : vector<8x4xf32>, vector<8x4xf32>, vector<8x8xf32> -> vector<8x8xf32>
    %3 = tpu.iota {dimensions = array<i32: 0>} : vector<8x8xi32>
    %4 = tpu.iota {dimensions = array<i32: 1>} : vector<8x8xi32>
    %5 = arith.cmpi eq, %3, %4 : vector<8x8xi32>
    %6 = arith.extui %5 : vector<8x8xi1> to vector<8x8xi32>
    %7 = arith.sitofp %6 : vector<8x8xi32> to vector<8x8xf32>
    %8 = arith.mulf %2, %7 : vector<8x8xf32>
    %cst_3 = arith.constant dense<0.000000e+00> : vector<8xf32>
    %9 = vector.multi_reduction <add>, %8, %cst_3 [1] : vector<8x8xf32> to vector<8xf32>
    %10 = vector.shape_cast %9 : vector<8xf32> to vector<8x1xf32>
    %11 = arith.mulf %2, %7 : vector<8x8xf32>
    %cst_4 = arith.constant dense<0.000000e+00> : vector<8xf32>
    %12 = vector.multi_reduction <add>, %11, %cst_4 [0] : vector<8x8xf32> to vector<8xf32>
    %13 = vector.shape_cast %12 : vector<8xf32> to vector<1x8xf32>
    %14 = vector.broadcast %10 : vector<8x1xf32> to vector<8x8xf32>
    %15 = vector.broadcast %13 : vector<1x8xf32> to vector<8x8xf32>
    %16 = arith.addf %14, %15 : vector<8x8xf32>
    %cst_5 = arith.constant 2.000000e+00 : f32
    %17 = vector.broadcast %cst_5 : f32 to vector<8x8xf32>
    %18 = arith.mulf %17, %2 : vector<8x8xf32>
    %19 = arith.subf %16, %18 : vector<8x8xf32>
    %cst_6 = arith.constant 0.000000e+00 : f32
    %20 = vector.broadcast %cst_6 : f32 to vector<8x8xf32>
    %21 = arith.subf %20, %19 : vector<8x8xf32>
    %22 = math.exp %21 : vector<8x8xf32>
    %23 = arith.addf %22, %7 : vector<8x8xf32>
    %cst_7 = arith.constant dense<0.000000e+00> : vector<8xf32>
    %24 = vector.multi_reduction <add>, %23, %cst_7 [1] : vector<8x8xf32> to vector<8xf32>
    %25 = vector.shape_cast %24 : vector<8xf32> to vector<8x1xf32>
    %cst_8 = arith.constant dense<0.000000e+00> : vector<8xf32>
    %26 = vector.multi_reduction <add>, %23, %cst_8 [0] : vector<8x8xf32> to vector<8xf32>
    %27 = vector.shape_cast %26 : vector<8xf32> to vector<1x8xf32>
    %28 = math.rsqrt %25 : vector<8x1xf32>
    %29 = vector.broadcast %28 : vector<8x1xf32> to vector<8x8xf32>
    %30 = arith.mulf %29, %23 : vector<8x8xf32>
    %31 = math.rsqrt %27 : vector<1x8xf32>
    %32 = vector.broadcast %31 : vector<1x8xf32> to vector<8x8xf32>
    %33 = arith.mulf %30, %32 : vector<8x8xf32>
    %cst_9 = arith.constant dense<0.000000e+00> : vector<8x4xf32>
    %34 = tpu.matmul %33, %1, %cst_9 {dimension_numbers = #tpu.dot_dimension_numbers<[1], [0], [0], [1], [0, 0, 1, 1], [], []>} : vector<8x8xf32>, vector<8x4xf32>, vector<8x4xf32> -> vector<8x4xf32>
    %c0_10 = arith.constant 0 : index
    %c0_11 = arith.constant 0 : index
    %c0_12 = arith.constant 0 : index
    %35 = vector.load %arg3[%c0_10, %c0_11, %c0_12] : memref<1x4x8xf32, #tpu.memory_space<vmem>>, vector<1x4x8xf32>
    %36 = vector.shape_cast %35 : vector<1x4x8xf32> to vector<4x8xf32>
    %cst_13 = arith.constant dense<0.000000e+00> : vector<8x8xf32>
    %37 = tpu.matmul %34, %36, %cst_13 {dimension_numbers = #tpu.dot_dimension_numbers<[1], [0], [0], [1], [0, 0, 1, 1], [], []>} : vector<8x4xf32>, vector<4x8xf32>, vector<8x8xf32> -> vector<8x8xf32>
    %c0_14 = arith.constant 0 : index
    %c0_15 = arith.constant 0 : index
    %c0_16 = arith.constant 0 : index
    %c0_17 = arith.constant 0 : index
    %38 = vector.load %arg4[%c0_14, %c0_15, %c0_16, %c0_17] : memref<1x1x8x8xf32, #tpu.memory_space<vmem>>, vector<1x1x8x8xf32>
    %39 = vector.shape_cast %38 : vector<1x1x8x8xf32> to vector<8x8xf32>
    %40 = vector.shape_cast %37 : vector<8x8xf32> to vector<1x1x8x8xf32>
    tpu.vector_store %arg4[%c0_14, %c0_15, %c0_16, %c0_17], %40 {strides = array<i32>} : memref<1x1x8x8xf32, #tpu.memory_space<vmem>>, vector<1x1x8x8xf32>,
    return
  }
  func.func @transform_0(%arg0: i32, %arg1: i32) -> (i32, i32, i32, i32) {
    %c0_i32 = arith.constant 0 : i32
    %c0_i32_0 = arith.constant 0 : i32
    %c0_i32_1 = arith.constant 0 : i32
    return %arg0, %arg1, %c0_i32, %c0_i32_0 : i32, i32, i32, i32
  }
  func.func @transform_1(%arg0: i32, %arg1: i32) -> (i32, i32, i32) {
    %c0_i32 = arith.constant 0 : i32
    %c0_i32_0 = arith.constant 0 : i32
    %c0_i32_1 = arith.constant 0 : i32
    return %arg1, %c0_i32, %c0_i32_0 : i32, i32, i32
  }
  func.func @transform_2(%arg0: i32, %arg1: i32) -> (i32, i32, i32, i32) {
    %c0_i32 = arith.constant 0 : i32
    %c0_i32_0 = arith.constant 0 : i32
    %c0_i32_1 = arith.constant 0 : i32
    return %arg0, %arg1, %c0_i32, %c0_i32_0 : i32, i32, i32, i32
  }
}

module attributes {stable_mosaic.version = 11 : i64} {
  func.func @_lstm_kernel(%arg0: i32, %arg1: i32, %arg2: memref<1x2x64xf32, #tpu.memory_space<vmem>>, %arg3: memref<4x64x32xf32, #tpu.memory_space<vmem>>, %arg4: memref<4x32x32xf32, #tpu.memory_space<vmem>>, %arg5: memref<4x1x32xf32, #tpu.memory_space<vmem>>, %arg6: memref<2x32xf32, #tpu.memory_space<vmem>>, %arg7: memref<2x32xf32, #tpu.memory_space<vmem>>, %arg8: memref<2x32xf32, #tpu.memory_space<vmem>>) attributes {dimension_semantics = [#tpu.dimension_semantics<parallel>, #tpu.dimension_semantics<arbitrary>], iteration_bounds = array<i64: 1, 4>, scalar_prefetch = 0 : i64, scratch_operands = 2 : i64, tpu.core_type = #tpu.core_type<tc>, window_params = [{transform_indices = @transform_0, window_bounds = array<i64: 1, 2, 64>}, {pipeline_mode = #tpu.pipeline_mode<synchronous>, transform_indices = @transform_1, window_bounds = array<i64: 4, 64, 32>}, {pipeline_mode = #tpu.pipeline_mode<synchronous>, transform_indices = @transform_2, window_bounds = array<i64: 4, 32, 32>}, {pipeline_mode = #tpu.pipeline_mode<synchronous>, transform_indices = @transform_3, window_bounds = array<i64: 4, 1, 32>}, {transform_indices = @transform_4, window_bounds = array<i64: 2, 32>}]} {
    %c0_i32 = arith.constant 0 : i32
    %0 = arith.cmpi eq, %arg1, %c0_i32 : i32
    %1 = arith.extui %0 : i1 to i32
    %c0_i32_0 = arith.constant 0 : i32
    %2 = arith.cmpi ne, %1, %c0_i32_0 : i32
    scf.if %2 {
      %cst_55 = arith.constant 0.000000e+00 : f32
      %77 = vector.broadcast %cst_55 : f32 to vector<2x32xf32>
      %c0_56 = arith.constant 0 : index
      %c0_57 = arith.constant 0 : index
      %78 = vector.load %arg7[%c0_56, %c0_57] : memref<2x32xf32, #tpu.memory_space<vmem>>, vector<2x32xf32>
      tpu.vector_store %arg7[%c0_56, %c0_57], %77 {strides = array<i32>} : memref<2x32xf32, #tpu.memory_space<vmem>>, vector<2x32xf32>,
      %cst_58 = arith.constant 0.000000e+00 : f32
      %79 = vector.broadcast %cst_58 : f32 to vector<2x32xf32>
      %c0_59 = arith.constant 0 : index
      %c0_60 = arith.constant 0 : index
      %80 = vector.load %arg8[%c0_59, %c0_60] : memref<2x32xf32, #tpu.memory_space<vmem>>, vector<2x32xf32>
      tpu.vector_store %arg8[%c0_59, %c0_60], %79 {strides = array<i32>} : memref<2x32xf32, #tpu.memory_space<vmem>>, vector<2x32xf32>,
    } else {
    }
    %c0 = arith.constant 0 : index
    %c0_1 = arith.constant 0 : index
    %c0_2 = arith.constant 0 : index
    %3 = vector.load %arg2[%c0, %c0_1, %c0_2] : memref<1x2x64xf32, #tpu.memory_space<vmem>>, vector<1x2x64xf32>
    %4 = vector.shape_cast %3 : vector<1x2x64xf32> to vector<2x64xf32>
    %c0_3 = arith.constant 0 : index
    %c0_4 = arith.constant 0 : index
    %5 = vector.load %arg7[%c0_3, %c0_4] : memref<2x32xf32, #tpu.memory_space<vmem>>, vector<2x32xf32>
    %c0_5 = arith.constant 0 : index
    %c0_6 = arith.constant 0 : index
    %6 = vector.load %arg8[%c0_5, %c0_6] : memref<2x32xf32, #tpu.memory_space<vmem>>, vector<2x32xf32>
    %c0_7 = arith.constant 0 : index
    %c0_8 = arith.constant 0 : index
    %c0_9 = arith.constant 0 : index
    %7 = vector.load %arg3[%c0_7, %c0_8, %c0_9] : memref<4x64x32xf32, #tpu.memory_space<vmem>>, vector<1x64x32xf32>
    %8 = vector.shape_cast %7 : vector<1x64x32xf32> to vector<64x32xf32>
    %cst = arith.constant dense<0.000000e+00> : vector<2x32xf32>
    %9 = tpu.matmul %4, %8, %cst {dimension_numbers = #tpu.dot_dimension_numbers<[1], [0], [0], [1], [0, 0, 1, 1], [], []>} : vector<2x64xf32>, vector<64x32xf32>, vector<2x32xf32> -> vector<2x32xf32>
    %c0_10 = arith.constant 0 : index
    %c0_11 = arith.constant 0 : index
    %c0_12 = arith.constant 0 : index
    %10 = vector.load %arg4[%c0_10, %c0_11, %c0_12] : memref<4x32x32xf32, #tpu.memory_space<vmem>>, vector<1x32x32xf32>
    %11 = vector.shape_cast %10 : vector<1x32x32xf32> to vector<32x32xf32>
    %cst_13 = arith.constant dense<0.000000e+00> : vector<2x32xf32>
    %12 = tpu.matmul %5, %11, %cst_13 {dimension_numbers = #tpu.dot_dimension_numbers<[1], [0], [0], [1], [0, 0, 1, 1], [], []>} : vector<2x32xf32>, vector<32x32xf32>, vector<2x32xf32> -> vector<2x32xf32>
    %13 = arith.addf %9, %12 : vector<2x32xf32>
    %c0_14 = arith.constant 0 : index
    %c0_15 = arith.constant 0 : index
    %c0_16 = arith.constant 0 : index
    %14 = vector.load %arg5[%c0_14, %c0_15, %c0_16] : memref<4x1x32xf32, #tpu.memory_space<vmem>>, vector<1x1x32xf32>
    %15 = vector.shape_cast %14 : vector<1x1x32xf32> to vector<1x32xf32>
    %16 = vector.broadcast %15 : vector<1x32xf32> to vector<2x32xf32>
    %17 = arith.addf %13, %16 : vector<2x32xf32>
    %18 = arith.negf %17 : vector<2x32xf32>
    %19 = math.exp %18 : vector<2x32xf32>
    %cst_17 = arith.constant 1.000000e+00 : f32
    %20 = vector.broadcast %cst_17 : f32 to vector<2x32xf32>
    %21 = arith.addf %20, %19 : vector<2x32xf32>
    %22 = arith.divf %20, %21 : vector<2x32xf32>
    %c1 = arith.constant 1 : index
    %c0_18 = arith.constant 0 : index
    %c0_19 = arith.constant 0 : index
    %23 = vector.load %arg3[%c1, %c0_18, %c0_19] : memref<4x64x32xf32, #tpu.memory_space<vmem>>, vector<1x64x32xf32>
    %24 = vector.shape_cast %23 : vector<1x64x32xf32> to vector<64x32xf32>
    %cst_20 = arith.constant dense<0.000000e+00> : vector<2x32xf32>
    %25 = tpu.matmul %4, %24, %cst_20 {dimension_numbers = #tpu.dot_dimension_numbers<[1], [0], [0], [1], [0, 0, 1, 1], [], []>} : vector<2x64xf32>, vector<64x32xf32>, vector<2x32xf32> -> vector<2x32xf32>
    %c1_21 = arith.constant 1 : index
    %c0_22 = arith.constant 0 : index
    %c0_23 = arith.constant 0 : index
    %26 = vector.load %arg4[%c1_21, %c0_22, %c0_23] : memref<4x32x32xf32, #tpu.memory_space<vmem>>, vector<1x32x32xf32>
    %27 = vector.shape_cast %26 : vector<1x32x32xf32> to vector<32x32xf32>
    %cst_24 = arith.constant dense<0.000000e+00> : vector<2x32xf32>
    %28 = tpu.matmul %5, %27, %cst_24 {dimension_numbers = #tpu.dot_dimension_numbers<[1], [0], [0], [1], [0, 0, 1, 1], [], []>} : vector<2x32xf32>, vector<32x32xf32>, vector<2x32xf32> -> vector<2x32xf32>
    %29 = arith.addf %25, %28 : vector<2x32xf32>
    %c1_25 = arith.constant 1 : index
    %c0_26 = arith.constant 0 : index
    %c0_27 = arith.constant 0 : index
    %30 = vector.load %arg5[%c1_25, %c0_26, %c0_27] : memref<4x1x32xf32, #tpu.memory_space<vmem>>, vector<1x1x32xf32>
    %31 = vector.shape_cast %30 : vector<1x1x32xf32> to vector<1x32xf32>
    %32 = vector.broadcast %31 : vector<1x32xf32> to vector<2x32xf32>
    %33 = arith.addf %29, %32 : vector<2x32xf32>
    %34 = arith.negf %33 : vector<2x32xf32>
    %35 = math.exp %34 : vector<2x32xf32>
    %cst_28 = arith.constant 1.000000e+00 : f32
    %36 = vector.broadcast %cst_28 : f32 to vector<2x32xf32>
    %37 = arith.addf %36, %35 : vector<2x32xf32>
    %38 = arith.divf %36, %37 : vector<2x32xf32>
    %c2 = arith.constant 2 : index
    %c0_29 = arith.constant 0 : index
    %c0_30 = arith.constant 0 : index
    %39 = vector.load %arg3[%c2, %c0_29, %c0_30] : memref<4x64x32xf32, #tpu.memory_space<vmem>>, vector<1x64x32xf32>
    %40 = vector.shape_cast %39 : vector<1x64x32xf32> to vector<64x32xf32>
    %cst_31 = arith.constant dense<0.000000e+00> : vector<2x32xf32>
    %41 = tpu.matmul %4, %40, %cst_31 {dimension_numbers = #tpu.dot_dimension_numbers<[1], [0], [0], [1], [0, 0, 1, 1], [], []>} : vector<2x64xf32>, vector<64x32xf32>, vector<2x32xf32> -> vector<2x32xf32>
    %c2_32 = arith.constant 2 : index
    %c0_33 = arith.constant 0 : index
    %c0_34 = arith.constant 0 : index
    %42 = vector.load %arg4[%c2_32, %c0_33, %c0_34] : memref<4x32x32xf32, #tpu.memory_space<vmem>>, vector<1x32x32xf32>
    %43 = vector.shape_cast %42 : vector<1x32x32xf32> to vector<32x32xf32>
    %cst_35 = arith.constant dense<0.000000e+00> : vector<2x32xf32>
    %44 = tpu.matmul %5, %43, %cst_35 {dimension_numbers = #tpu.dot_dimension_numbers<[1], [0], [0], [1], [0, 0, 1, 1], [], []>} : vector<2x32xf32>, vector<32x32xf32>, vector<2x32xf32> -> vector<2x32xf32>
    %45 = arith.addf %41, %44 : vector<2x32xf32>
    %c2_36 = arith.constant 2 : index
    %c0_37 = arith.constant 0 : index
    %c0_38 = arith.constant 0 : index
    %46 = vector.load %arg5[%c2_36, %c0_37, %c0_38] : memref<4x1x32xf32, #tpu.memory_space<vmem>>, vector<1x1x32xf32>
    %47 = vector.shape_cast %46 : vector<1x1x32xf32> to vector<1x32xf32>
    %48 = vector.broadcast %47 : vector<1x32xf32> to vector<2x32xf32>
    %49 = arith.addf %45, %48 : vector<2x32xf32>
    %50 = math.tanh %49 : vector<2x32xf32>
    %c3 = arith.constant 3 : index
    %c0_39 = arith.constant 0 : index
    %c0_40 = arith.constant 0 : index
    %51 = vector.load %arg3[%c3, %c0_39, %c0_40] : memref<4x64x32xf32, #tpu.memory_space<vmem>>, vector<1x64x32xf32>
    %52 = vector.shape_cast %51 : vector<1x64x32xf32> to vector<64x32xf32>
    %cst_41 = arith.constant dense<0.000000e+00> : vector<2x32xf32>
    %53 = tpu.matmul %4, %52, %cst_41 {dimension_numbers = #tpu.dot_dimension_numbers<[1], [0], [0], [1], [0, 0, 1, 1], [], []>} : vector<2x64xf32>, vector<64x32xf32>, vector<2x32xf32> -> vector<2x32xf32>
    %c3_42 = arith.constant 3 : index
    %c0_43 = arith.constant 0 : index
    %c0_44 = arith.constant 0 : index
    %54 = vector.load %arg4[%c3_42, %c0_43, %c0_44] : memref<4x32x32xf32, #tpu.memory_space<vmem>>, vector<1x32x32xf32>
    %55 = vector.shape_cast %54 : vector<1x32x32xf32> to vector<32x32xf32>
    %cst_45 = arith.constant dense<0.000000e+00> : vector<2x32xf32>
    %56 = tpu.matmul %5, %55, %cst_45 {dimension_numbers = #tpu.dot_dimension_numbers<[1], [0], [0], [1], [0, 0, 1, 1], [], []>} : vector<2x32xf32>, vector<32x32xf32>, vector<2x32xf32> -> vector<2x32xf32>
    %57 = arith.addf %53, %56 : vector<2x32xf32>
    %c3_46 = arith.constant 3 : index
    %c0_47 = arith.constant 0 : index
    %c0_48 = arith.constant 0 : index
    %58 = vector.load %arg5[%c3_46, %c0_47, %c0_48] : memref<4x1x32xf32, #tpu.memory_space<vmem>>, vector<1x1x32xf32>
    %59 = vector.shape_cast %58 : vector<1x1x32xf32> to vector<1x32xf32>
    %60 = vector.broadcast %59 : vector<1x32xf32> to vector<2x32xf32>
    %61 = arith.addf %57, %60 : vector<2x32xf32>
    %62 = arith.negf %61 : vector<2x32xf32>
    %63 = math.exp %62 : vector<2x32xf32>
    %cst_49 = arith.constant 1.000000e+00 : f32
    %64 = vector.broadcast %cst_49 : f32 to vector<2x32xf32>
    %65 = arith.addf %64, %63 : vector<2x32xf32>
    %66 = arith.divf %64, %65 : vector<2x32xf32>
    %67 = arith.mulf %38, %6 : vector<2x32xf32>
    %68 = arith.mulf %22, %50 : vector<2x32xf32>
    %69 = arith.addf %67, %68 : vector<2x32xf32>
    %70 = math.tanh %69 : vector<2x32xf32>
    %71 = arith.mulf %66, %70 : vector<2x32xf32>
    %c0_50 = arith.constant 0 : index
    %c0_51 = arith.constant 0 : index
    %72 = vector.load %arg7[%c0_50, %c0_51] : memref<2x32xf32, #tpu.memory_space<vmem>>, vector<2x32xf32>
    tpu.vector_store %arg7[%c0_50, %c0_51], %71 {strides = array<i32>} : memref<2x32xf32, #tpu.memory_space<vmem>>, vector<2x32xf32>,
    %c0_52 = arith.constant 0 : index
    %c0_53 = arith.constant 0 : index
    %73 = vector.load %arg8[%c0_52, %c0_53] : memref<2x32xf32, #tpu.memory_space<vmem>>, vector<2x32xf32>
    tpu.vector_store %arg8[%c0_52, %c0_53], %69 {strides = array<i32>} : memref<2x32xf32, #tpu.memory_space<vmem>>, vector<2x32xf32>,
    %c3_i32 = arith.constant 3 : i32
    %74 = arith.cmpi eq, %arg1, %c3_i32 : i32
    %75 = arith.extui %74 : i1 to i32
    %c0_i32_54 = arith.constant 0 : i32
    %76 = arith.cmpi ne, %75, %c0_i32_54 : i32
    scf.if %76 {
      %c0_55 = arith.constant 0 : index
      %c0_56 = arith.constant 0 : index
      %77 = vector.load %arg6[%c0_55, %c0_56] : memref<2x32xf32, #tpu.memory_space<vmem>>, vector<2x32xf32>
      tpu.vector_store %arg6[%c0_55, %c0_56], %71 {strides = array<i32>} : memref<2x32xf32, #tpu.memory_space<vmem>>, vector<2x32xf32>,
    } else {
    }
    return
  }
  func.func @transform_0(%arg0: i32, %arg1: i32) -> (i32, i32, i32) {
    %c0_i32 = arith.constant 0 : i32
    %c0_i32_0 = arith.constant 0 : i32
    return %arg1, %arg0, %c0_i32 : i32, i32, i32
  }
  func.func @transform_1(%arg0: i32, %arg1: i32) -> (i32, i32, i32) {
    %c0_i32 = arith.constant 0 : i32
    %c0_i32_0 = arith.constant 0 : i32
    %c0_i32_1 = arith.constant 0 : i32
    %c0_i32_2 = arith.constant 0 : i32
    return %c0_i32, %c0_i32_0, %c0_i32_1 : i32, i32, i32
  }
  func.func @transform_2(%arg0: i32, %arg1: i32) -> (i32, i32, i32) {
    %c0_i32 = arith.constant 0 : i32
    %c0_i32_0 = arith.constant 0 : i32
    %c0_i32_1 = arith.constant 0 : i32
    %c0_i32_2 = arith.constant 0 : i32
    return %c0_i32, %c0_i32_0, %c0_i32_1 : i32, i32, i32
  }
  func.func @transform_3(%arg0: i32, %arg1: i32) -> (i32, i32, i32) {
    %c0_i32 = arith.constant 0 : i32
    %c0_i32_0 = arith.constant 0 : i32
    %c0_i32_1 = arith.constant 0 : i32
    %c0_i32_2 = arith.constant 0 : i32
    return %c0_i32, %c0_i32_0, %c0_i32_1 : i32, i32, i32
  }
  func.func @transform_4(%arg0: i32, %arg1: i32) -> (i32, i32) {
    %c0_i32 = arith.constant 0 : i32
    %c0_i32_0 = arith.constant 0 : i32
    return %arg0, %c0_i32 : i32, i32
  }
}

module attributes {stable_mosaic.version = 11 : i64} {
  func.func @_ffn_kernel(%arg0: i32, %arg1: memref<2x32xf32, #tpu.memory_space<vmem>>, %arg2: memref<32x128xf32, #tpu.memory_space<vmem>>, %arg3: memref<1x128xf32, #tpu.memory_space<vmem>>, %arg4: memref<2x128xf32, #tpu.memory_space<vmem>>) attributes {dimension_semantics = [#tpu.dimension_semantics<parallel>], iteration_bounds = array<i64: 1>, scalar_prefetch = 0 : i64, scratch_operands = 0 : i64, tpu.core_type = #tpu.core_type<tc>, window_params = [{transform_indices = @transform_0, window_bounds = array<i64: 2, 32>}, {pipeline_mode = #tpu.pipeline_mode<synchronous>, transform_indices = @transform_1, window_bounds = array<i64: 32, 128>}, {pipeline_mode = #tpu.pipeline_mode<synchronous>, transform_indices = @transform_2, window_bounds = array<i64: 1, 128>}, {transform_indices = @transform_3, window_bounds = array<i64: 2, 128>}]} {
    %c0 = arith.constant 0 : index
    %c0_0 = arith.constant 0 : index
    %0 = vector.load %arg1[%c0, %c0_0] : memref<2x32xf32, #tpu.memory_space<vmem>>, vector<2x32xf32>
    %c0_1 = arith.constant 0 : index
    %c0_2 = arith.constant 0 : index
    %1 = vector.load %arg2[%c0_1, %c0_2] : memref<32x128xf32, #tpu.memory_space<vmem>>, vector<32x128xf32>
    %cst = arith.constant dense<0.000000e+00> : vector<2x128xf32>
    %2 = tpu.matmul %0, %1, %cst {dimension_numbers = #tpu.dot_dimension_numbers<[1], [0], [0], [1], [0, 0, 1, 1], [], []>} : vector<2x32xf32>, vector<32x128xf32>, vector<2x128xf32> -> vector<2x128xf32>
    %c0_3 = arith.constant 0 : index
    %c0_4 = arith.constant 0 : index
    %3 = vector.load %arg3[%c0_3, %c0_4] : memref<1x128xf32, #tpu.memory_space<vmem>>, vector<1x128xf32>
    %4 = vector.broadcast %3 : vector<1x128xf32> to vector<2x128xf32>
    %5 = arith.addf %2, %4 : vector<2x128xf32>
    %6 = arith.negf %5 : vector<2x128xf32>
    %7 = math.exp %6 : vector<2x128xf32>
    %cst_5 = arith.constant 1.000000e+00 : f32
    %8 = vector.broadcast %cst_5 : f32 to vector<2x128xf32>
    %9 = arith.addf %8, %7 : vector<2x128xf32>
    %10 = arith.divf %8, %9 : vector<2x128xf32>
    %c0_6 = arith.constant 0 : index
    %c0_7 = arith.constant 0 : index
    %11 = vector.load %arg4[%c0_6, %c0_7] : memref<2x128xf32, #tpu.memory_space<vmem>>, vector<2x128xf32>
    tpu.vector_store %arg4[%c0_6, %c0_7], %10 {strides = array<i32>} : memref<2x128xf32, #tpu.memory_space<vmem>>, vector<2x128xf32>,
    return
  }
  func.func @transform_0(%arg0: i32) -> (i32, i32) {
    %c0_i32 = arith.constant 0 : i32
    %c0_i32_0 = arith.constant 0 : i32
    return %arg0, %c0_i32 : i32, i32
  }
  func.func @transform_1(%arg0: i32) -> (i32, i32) {
    %c0_i32 = arith.constant 0 : i32
    %c0_i32_0 = arith.constant 0 : i32
    %c0_i32_1 = arith.constant 0 : i32
    return %c0_i32, %c0_i32_0 : i32, i32
  }
  func.func @transform_2(%arg0: i32) -> (i32, i32) {
    %c0_i32 = arith.constant 0 : i32
    %c0_i32_0 = arith.constant 0 : i32
    %c0_i32_1 = arith.constant 0 : i32
    return %c0_i32, %c0_i32_0 : i32, i32
  }
  func.func @transform_3(%arg0: i32) -> (i32, i32) {
    %c0_i32 = arith.constant 0 : i32
    %c0_i32_0 = arith.constant 0 : i32
    return %arg0, %c0_i32 : i32, i32
  }
}

</mosaic_0001>

<bundles_post_ra>
// kernel: generator_forward.5
= control target key start
LH: loop header
LB: loop body
LE: loop exit
PB: predicated region body
PF: predicated region fallthrough
CT: control target
= control target key end

     0   :  { %v179_v3 = vmov 0.0|0.0   ;;  %vm180_vm0 = vmmov 0   ;;  %v181_v6 = vmov 0.0   ;;  %s233_s0 = inlined_call_operand.vmem [shape: f32[2,32], index: 0, kind: input, shape index: {}]   ;;  %s234_s1 = inlined_call_operand.vmem [shape: f32[32,128], index: 1, kind: input, shape index: {}]   ;;  %s235_s2 = inlined_call_operand.vmem [shape: f32[1,128], index: 2, kind: input, shape index: {}]   ;;  %s236_s3 = inlined_call_operand.hbm [shape: f32[2,128], index: 3, kind: output, shape index: {}]  }
   0x1   :  { %v16_v0 = vld [vmem:[%s234_s1] sm:$0xff]  ;;  %v17_v1 = vld [vmem:[%s234_s1 + $0x8] sm:$0xff]  ;;  %v18_v2 = vld [vmem:[%s234_s1 + $0x10] sm:$0xff]  ;;  %141 = vmatprep.subr.bf16.mxu0 %v179_v3  ;;  %138 = vmatprep.mubr.msk.f32.mxu0 %vm180_vm0, %v181_v6 }
   0x2   :  { %v142_v4 = vpack.c.bf16 %v17_v1, %v16_v0  ;;  %v19_v5 = vld [vmem:[%s234_s1 + $0x18] sm:$0xff] }
   0x3   :  { %8 = vsyncpa [#allocation3], 0  ;;  %v145_v7 = vpack.c.bf16 %v19_v5, %v18_v2  ;;  %v15_v8 = vld [vmem:[%s233_s0] sm:$0x3]  ;;  %vm27_vm1 = vcmask 261120   ;;  %s182_s1 = smov [#allocation2]  }
   0x4   :  { %143 = vmatpush3.bf16.msra.mxu0 %v142_v4  ;;  %v122_v9 = vld [vmem:[%s235_s2] ss:$0 sm:$0xff]  ;;  %s114_s24 = sshll.u32 %s182_s1, 4  ;;  %s115_s24 = int_to_ptr.vmem [resolvable:$true] %s114_s24 }
   0x5   :  { %144 = vmatprep.subr.bf16.mxu0 %v179_v3  ;;  %s155_s0 = scalar_lea.vmem %s115_s24, 32  ;;  %p160_p1 = scmp.lt.s32.totalorder %s115_s24, %s115_s24 }
   0x6   :  { %p156_p0 = scmp.ne.s32.totalorder %s115_s24, %s155_s0  ;;  %p161_p2 = scmp.lt.s32.totalorder %s155_s0, %s155_s0 }
   0x8   :  { %146 = vmatpush3.bf16.msra.mxu0 %v145_v7  ;;  %p162_p3 = por %p161_p2, %p160_p1 }
   0xa   :  { %p163_p4 = pnand %p162_p3, %p156_p0 }
   0xb   :  { %139 = vmatmul.mubr.msk.f32.vlgmr.msra.gmra.mrb[0].mxu0 %vm27_vm1, %v15_v8 }
  0xde   :  { %v97_v10 = vpop.f32.mrb[0].mxu0 }
  0xdf   :  { %v98_v11 = vadd.f32 %v122_v9, %v97_v10  ;;  %v140_v12 = vpop.f32.mrb[1].mxu0 }
  0xe1   :  { %v124_v13 = vmul.f32 -1.442695, %v98_v11 }
  0xe3   :  { %151 = vpow2.f32 %v124_v13 }
  0xed   :  { %v152_v14 = vpop.eup %151 }
  0xee   :  { %v104_v15 = vadd.f32 1.0, %v152_v14 }
  0xf0   :  { %153 = vrcp.f32 %v104_v15 }
  0xfa   :  { %v154_v16 = vpop.eup %153 }
  0xfb   :  { %107 = vst [vmem:[#allocation2] sm:$0x3] %v154_v16 }
  0xfc   :  { %166 = shalt.err (!%p163_p4)
}
  0xfd   :  { %s167_s26 = scalar_lea.hbm %s236_s3, 32 }
  0xfe   :  { %p168_p5 = scmp.ne.s32.totalorder %s236_s3, %s167_s26  ;;  %p171_p6 = scmp.lt.u32.totalorder %s167_s26, %s236_s3 }
 0x100   :  { %p173_p7 = pnand %p171_p6, %p168_p5 }
 0x102   :  { %176 = shalt.err (!%p173_p7)
}
 0x103   :  { %117 = dma.vmem_to_hbm [thread:$0]  %s115_s24, 32, %s236_s3, [#allocation3]  }
 0x104   :  { %177 = dma.done.wait [#allocation3], 32  }
 0x105   :  { %178 = vsyncadd [#allocation3], 4294967264 }
 0x106   :  { %121 = vsyncpa [#allocation3], 1 }

// kernel: generator_forward.3
= control target key start
LH: loop header
LB: loop body
LE: loop exit
PB: predicated region body
PF: predicated region fallthrough
CT: control target
= control target key end

     0   :  { %s699_s9 = smov 0   ;;  %s701_s10 = smov 0   ;;  %s781_s0 = inlined_call_operand.vmem [shape: f32[2,4,8,4], index: 0, kind: input, shape index: {}]   ;;  %s782_s1 = inlined_call_operand.vmem [shape: f32[4,4,8], index: 1, kind: input, shape index: {}]   ;;  %s783_s2 = inlined_call_operand.vmem [shape: f32[2,4,8,8], index: 2, kind: output, shape index: {}]  }
   0x1   :  { %s703_s11 = smov 0   ;;  %s705_s12 = smov 0  }
   0x2   :  { %s707_s13 = smov 0  }
   0x3 LB: > { %s21_s14 = sadd.s32 1, %s672_s11  ;;  %s24_s15 = sadd.s32 1, %s676_s12  ;;  %s680_s13 = sphi %s707_s13, %s12_s13   ;;  %s676_s12 = sphi %s705_s12, %s787_s12   ;;  %s672_s11 = sphi %s703_s11, %s786_s11   ;;  %s668_s10 = sphi %s701_s10, %s785_s10   ;;  %s664_s9 = sphi %s699_s9, %s784_s9  }
   0x4   : > { %p22_p0 = scmp.ge.s32.totalorder %s21_s14, 4  ;;  %p559_p1 = scmp.ge.s32.totalorder %s680_s13, 1 }
   0x5   : > { %p140_p2 = scmp.lt.s32.totalorder %s680_s13, 9 }
   0x6   : > { %s789_s14 = smov (%p22_p0, %s21_s14), 0  ;;  %s791_s15 = smov (!%p22_p0, %s24_s15), %s676_s12 }
   0x7   : > { %p141_p3 = pnand %p559_p1, %p140_p2  ;;  %p26_p4 = scmp.ge.s32.totalorder %s791_s15, 2 }
   0x8   : > { %p172_p5 = scmp.lt.s32.totalorder (!%p141_p3), %s668_s10, 1  ;;  %p174_p6 = scmp.lt.s32.totalorder (!%p141_p3), %s664_s9, 3  ;;  %v682_v0 = vmov (!%p141_p3), 0.0   ;;  %vm683_vm0 = vmmov (!%p141_p3), 0   ;;  %vm193_vm1 = vcmask (!%p141_p3), 31744   ;;  %v267_v2 = vlaneseq (!%p141_p3) }
   0x9   : > { %s793_s15 = smov (%p26_p4, %s791_s15), 0  ;;  %144 = sbr.rel (%p141_p3) target bundleno = 986 (0x3da), region = 28 }
   0xa   : > { %579 = vmatprep.subr.mxu0 (!%p141_p3), %v682_v0  ;;  %581 = vmatprep.mubr.msk.f32.mxu0 (!%p141_p3), %vm683_vm0, %v682_v0  ;;  %v268_v3 = vshrl.u32 (!%p141_p3), %v267_v2, 7  ;;  %v270_v4 = vand.u32 (!%p141_p3), 127, %v267_v2  ;;  %vm275_vm3 = vcmask (!%p141_p3), 64512   ;;  %vm382_vm4 = vcmask (!%p141_p3), 1043456  }
   0xb   : > { %584 = vmatprep.subr.mxu1 (!%p141_p3), %v682_v0  ;;  %586 = vmatprep.mubr.msk.f32.mxu1 (!%p141_p3), %vm683_vm0, %v682_v0 }
   0xc   : > { %vm271_vm2 = vcmp.eq.s32.totalorder (!%p141_p3), %v268_v3, %v270_v4 }
   0xd   : > { %v567_v5 = vsel (!%p141_p3), %vm271_vm2, 1.0, %v682_v0 }
  0x10   : > { %s795_s10 = smov (!%p172_p5, %s668_s10), 1  ;;  %s797_s9 = smov (!%p174_p6, %s664_s9), 3 }
  0x11   : > { %s560_s16 = sshll.u32 %s795_s10, 2  ;;  %s562_s22 = sshll.u32 %s797_s9, 2 }
  0x12   : > { %s738_s17 = sadd.s32 %s560_s16, %s797_s9  ;;  %s183_s25 = scalar_lea.vmem %s782_s1, %s562_s22 }
  0x13   : > { %s561_s18 = sshll.u32 %s738_s17, 3  ;;  %v378_v36 = vld [vmem:[%s183_s25] sm:$0xf] }
  0x14   : > { %s179_s21 = scalar_lea.vmem %s781_s0, %s561_s18  ;;  %s191_s28 = scalar_lea.vmem %s783_s2, %s561_s18 }
  0x15   : > { %v192_v1 = vld [vmem:[%s179_s21] sm:$0xff] }
  0x16   : > { %580 = vmatpush3.xpose.msk.msra.mxu0 %vm193_vm1, %v192_v1  ;;  %585 = vmatpush3.msra.mxu1 %v192_v1 }
  0x17   : > { %589 = vmatprep.subr.mxu1 %v682_v0 }
  0x19   : > { %582 = vmatmul.mubr.msk.f32.vlgmr.msra.gmra.mrb[0].mxu0 %vm193_vm1, %v192_v1 }
  0xec   : > { %v263_v6 = vpop.f32.mrb[0].mxu0 }
  0xed   : > { %v274_v7 = vmul.f32 %v567_v5, %v263_v6  ;;  %v583_v8 = vpop.f32.mrb[1].mxu0  ;;  %v286_v17 = vmul.f32 2.0, %v263_v6 }
  0xef   : > { %v276_v9 = vsel %vm275_vm3, %v274_v7, 0.0 }
  0xf0   : > { %277 = vadd.xlane.f32.xlu0 %v276_v9  ;;  %v279_v10 = vrot.slane %v276_v9, 4 }
  0xf2   : > { %v280_v11 = vadd.f32 %v279_v10, %v276_v9 }
  0xf4   : > { %v281_v12 = vrot.slane %v280_v11, 2 }
  0xf6   : > { %v282_v13 = vadd.f32 %v281_v12, %v280_v11 }
  0xf8   : > { %v283_v14 = vrot.slane %v282_v13, 1 }
  0xfa   : > { %v284_v15 = vadd.f32 %v283_v14, %v282_v13 }
 0x17d   : > { %v278_v16 = vpop.xlane.xlu0 %277 }
 0x17e   : > { %v285_v18 = vadd.f32 %v284_v15, %v278_v16 }
 0x180   : > { %v287_v19 = vsub.f32 %v285_v18, %v286_v17 }
 0x182   : > { %v288_v20 = vsub.f32 0.0, %v287_v19 }
 0x184   : > { %v289_v21 = vmul.f32 1.442695, %v288_v20 }
 0x186   : > { %636 = vpow2.f32 %v289_v21 }
 0x190   : > { %v637_v22 = vpop.eup %636 }
 0x191   : > { %v291_v23 = vadd.f32 %v637_v22, %v567_v5 }
 0x193   : > { %v292_v24 = vsel %vm275_vm3, %v291_v23, 0.0 }
 0x194   : > { %293 = vadd.xlane.f32.xlu0 %v292_v24  ;;  %v295_v25 = vrot.slane %v292_v24, 4 }
 0x196   : > { %v296_v26 = vadd.f32 %v295_v25, %v292_v24 }
 0x198   : > { %v297_v27 = vrot.slane %v296_v26, 2 }
 0x19a   : > { %v298_v28 = vadd.f32 %v297_v27, %v296_v26 }
 0x19c   : > { %v299_v29 = vrot.slane %v298_v28, 1 }
 0x19e   : > { %v300_v30 = vadd.f32 %v299_v29, %v298_v28 }
 0x221   : > { %v294_v31 = vpop.xlane.xlu0 %293 }
 0x222   : > { %638 = vrsqrt.f32 %v294_v31 }
 0x223   : > { %640 = vrsqrt.f32 %v300_v30 }
 0x22c   : > { %v639_v32 = vpop.eup %638 }
 0x22d   : > { %v302_v33 = vmul.f32 %v639_v32, %v291_v23  ;;  %v641_v34 = vpop.eup %640 }
 0x22f   : > { %v304_v35 = vmul.f32 %v641_v34, %v302_v33 }
 0x231   : > { %587 = vmatmul.mubr.msk.f32.vlgmr.msra.gmra.mrb[0].mxu1 %vm275_vm3, %v304_v35 }
 0x232   : > { %590 = vmatpush3.msk.msra.mxu1 %vm382_vm4, %v378_v36  ;;  %591 = vmatprep.mubr.msk.f32.mxu1 %vm683_vm0, %v682_v0 }
 0x304   : > { %v374_v37 = vpop.f32.mrb[0].mxu1 }
 0x305   : > { %v588_v38 = vpop.f32.mrb[1].mxu1  ;;  %592 = vmatmul.mubr.msk.f32.vlgmr.msra.gmra.mrb[2].mxu1 %vm193_vm1, %v374_v37 }
 0x3d8   : > { %v452_v39 = vpop.f32.mrb[2].mxu1 }
 0x3d9   : > { %456 = vst.msk [vmem:[%s191_s28] sm:$0xff] %vm275_vm3, %v452_v39  ;;  %v593_v40 = vpop.f32.mrb[3].mxu1 }
 0x3da PF: > { %s12_s13 = sadd.s32 1, %s680_s13   ;;  %s784_s9 = smov %s672_s11 }
 0x3db   : > { %p9_p7 = scmp.ge.s32.totalorder %s12_s13, 10   ;;  %s785_s10 = smov %s676_s12 }
 0x3dc   : > { %s786_s11 = smov %s789_s14  ;;  %s787_s12 = smov %s793_s15 }
 0x3dd   :  { %11 = sbr.rel (!%p9_p7) target bundleno = 3 (0x3), region = 61 }

// kernel: generator_forward.4
= control target key start
LH: loop header
LB: loop body
LE: loop exit
PB: predicated region body
PF: predicated region fallthrough
CT: control target
= control target key end

     0   :  { %s1386_s15 = smov 0   ;;  %s1388_s16 = smov 0   ;;  %s1644_s0 = inlined_call_operand.vmem [shape: f32[4,2,64], index: 0, kind: input, shape index: {}]   ;;  %s1645_s1 = inlined_call_operand.vmem [shape: f32[4,64,32], index: 1, kind: input, shape index: {}]   ;;  %s1646_s2 = inlined_call_operand.vmem [shape: f32[4,32,32], index: 2, kind: input, shape index: {}]   ;;  %s1647_s3 = inlined_call_operand.vmem [shape: f32[4,1,32], index: 3, kind: input, shape index: {}]   ;;  %s1648_s4 = inlined_call_operand.vmem [shape: f32[2,32], index: 4, kind: output, shape index: {}]  }
   0x1   :  { %s1390_s17 = smov 0  }
   0x2 LB: > { %s23_s18 = sadd.s32 1, %s1351_s16  ;;  %p980_p0 = scmp.ge.s32.totalorder %s1355_s17, 1  ;;  %s1355_s17 = sphi %s1390_s17, %s14_s17   ;;  %s1351_s16 = sphi %s1388_s16, %s1650_s16   ;;  %s1347_s15 = sphi %s1386_s15, %s1649_s15  }
   0x3   : > { %p24_p1 = scmp.ge.s32.totalorder %s23_s18, 4  ;;  %p178_p2 = scmp.lt.s32.totalorder %s1355_s17, 5 }
   0x5   : > { %s1652_s18 = smov (%p24_p1, %s23_s18), 0  ;;  %p179_p3 = pnand %p980_p0, %p178_p2 }
   0x6   : > { %p205_p4 = scmp.lt.s32.totalorder (!%p179_p3), %s1347_s15, 3  ;;  %p982_p5 = scmp.ne.s32.totalorder (!%p179_p3), %s1347_s15, 0 }
   0x7   : > { %182 = sbr.rel (%p179_p3) target bundleno = 318 (0x13e), region = 36 }
   0xe   : > { %s206_s19 = scalar_select %p205_p4, %s1347_s15, 3 }
   0xf   : > { %219 = sbr.rel (%p982_p5) target bundleno = 22 (0x16), region = 40  ;;  %vm220_vm0 = vcmask (!%p982_p5), 254976   ;;  %v1357_v0 = vmov (!%p982_p5), 0.0  }
  0x10   : > { %s981_s20 = sshll.u32 %s206_s19, 1  ;;  %221 = vst.msk [vmem:[#allocation2] sm:$0x3] (!%p982_p5), %vm220_vm0, %v1357_v0  ;;  %222 = vst.msk [vmem:[#allocation3] sm:$0x3] (!%p982_p5), %vm220_vm0, %v1357_v0 }
  0x11   : > { %s1411_s23 = scalar_lea.vmem %s1644_s0, %s981_s20 }
  0x16 PF: > { %v234_v1 = vld [vmem:[%s1646_s2] sm:$0xff]  ;;  %v235_v2 = vld [vmem:[%s1646_s2 + $0x8] sm:$0xff]  ;;  %v1358_v4 = vmov 0.0|0.0   ;;  %v236_v7 = vld [vmem:[%s1646_s2 + $0x10] sm:$0xff]  ;;  %vm1359_vm1 = vmmov 0   ;;  %v1360_v12 = vmov 0.0  }
  0x17   : > { %v995_v3 = vld [vmem:[%s1646_s2 + $0x20] sm:$0xff]  ;;  %1217 = vmatprep.subr.bf16.mxu1 %v1358_v4  ;;  %1235 = vmatprep.subr.bf16.mxu0 %v1358_v4  ;;  %v1218_v5 = vpack.c.bf16 %v235_v2, %v234_v1  ;;  %v996_v6 = vld [vmem:[%s1646_s2 + $0x28] sm:$0xff]  ;;  %v237_v8 = vld [vmem:[%s1646_s2 + $0x18] sm:$0xff]  ;;  %vm238_vm2 = vcmask 261120   ;;  %vm312_vm3 = vcmask 523264   ;;  %vm907_vm4 = vcmask 254976  }
  0x18   : > { %v1236_v9 = vpack.c.bf16 %v996_v6, %v995_v3  ;;  %v997_v10 = vld [vmem:[%s1646_s2 + $0x30] sm:$0xff]  ;;  %v998_v11 = vld [vmem:[%s1646_s2 + $0x38] sm:$0xff]  ;;  %1105 = vmatprep.mubr.msk.f32.mxu1 %vm1359_vm1, %v1360_v12  ;;  %1135 = vmatprep.mubr.msk.f32.mxu0 %vm1359_vm1, %v1360_v12  ;;  %v1221_v13 = vpack.c.bf16 %v237_v8, %v236_v7  ;;  %v226_v15 = vld [vmem:[%s1645_s1] sm:$0xff]  ;;  %p1037_p6 = scmp.ne.s32.totalorder %s1347_s15, 3 }
  0x19   : > { %1219 = vmatpush3.bf16.msra.mxu1 %v1218_v5  ;;  %v1239_v14 = vpack.c.bf16 %v998_v11, %v997_v10  ;;  %v227_v16 = vld [vmem:[%s1645_s1 + $0x8] sm:$0xff]  ;;  %v987_v17 = vld [vmem:[%s1645_s1 + $0x40] sm:$0xff]  ;;  %v228_v22 = vld [vmem:[%s1645_s1 + $0x10] sm:$0xff] }
  0x1a   : > { %1237 = vmatpush3.bf16.msra.mxu0 %v1236_v9  ;;  %1220 = vmatprep.subr.bf16.mxu1 %v1358_v4  ;;  %v988_v18 = vld [vmem:[%s1645_s1 + $0x48] sm:$0xff]  ;;  %v1458_v19 = vld [vmem:[#allocation2] sm:$0x3]  ;;  %v1224_v20 = vpack.c.bf16 %v227_v16, %v226_v15  ;;  %v229_v23 = vld [vmem:[%s1645_s1 + $0x18] sm:$0xff] }
  0x1b   : > { %1238 = vmatprep.subr.bf16.mxu0 %v1358_v4  ;;  %v1242_v21 = vpack.c.bf16 %v988_v18, %v987_v17  ;;  %v989_v24 = vld [vmem:[%s1645_s1 + $0x50] sm:$0xff]  ;;  %v990_v25 = vld [vmem:[%s1645_s1 + $0x58] sm:$0xff]  ;;  %v1227_v26 = vpack.c.bf16 %v229_v23, %v228_v22  ;;  %v230_v28 = vld [vmem:[%s1645_s1 + $0x20] sm:$0xff] }
  0x1c   : > { %v1245_v27 = vpack.c.bf16 %v990_v25, %v989_v24  ;;  %v231_v29 = vld [vmem:[%s1645_s1 + $0x28] sm:$0xff]  ;;  %v991_v30 = vld [vmem:[%s1645_s1 + $0x60] sm:$0xff]  ;;  %v232_v34 = vld [vmem:[%s1645_s1 + $0x30] sm:$0xff] }
  0x1d   : > { %1222 = vmatpush3.bf16.msra.mxu1 %v1221_v13  ;;  %v992_v31 = vld [vmem:[%s1645_s1 + $0x68] sm:$0xff]  ;;  %v1230_v32 = vpack.c.bf16 %v231_v29, %v230_v28  ;;  %v233_v35 = vld [vmem:[%s1645_s1 + $0x38] sm:$0xff]  ;;  %v993_v36 = vld [vmem:[%s1645_s1 + $0x70] sm:$0xff] }
  0x1e   : > { %1240 = vmatpush3.bf16.msra.mxu0 %v1239_v14  ;;  %1223 = vmatprep.subr.bf16.mxu1 %v1358_v4  ;;  %v1248_v33 = vpack.c.bf16 %v992_v31, %v991_v30  ;;  %v994_v37 = vld [vmem:[%s1645_s1 + $0x78] sm:$0xff]  ;;  %v1233_v38 = vpack.c.bf16 %v233_v35, %v232_v34  ;;  %v1012_v40 = vld [vmem:[%s1646_s2 + $0x40] sm:$0xff]  ;;  %v1013_v41 = vld [vmem:[%s1646_s2 + $0x48] sm:$0xff] }
  0x1f   : > { %1241 = vmatprep.subr.bf16.mxu0 %v1358_v4  ;;  %v1251_v39 = vpack.c.bf16 %v994_v37, %v993_v36  ;;  %v1028_v42 = vld [vmem:[%s1646_s2 + $0x60] sm:$0xff]  ;;  %v1029_v43 = vld [vmem:[%s1646_s2 + $0x68] sm:$0xff]  ;;  %v1254_v45 = vpack.c.bf16 %v1013_v41, %v1012_v40  ;;  %v1014_v47 = vld [vmem:[%s1646_s2 + $0x50] sm:$0xff] }
  0x20   : > { %1106 = vmatmul.mubr.msk.f32.vlgmr.msra.gmra.mrb[0].mxu1 %vm238_vm2, %v1458_v19  ;;  %v1525_v44 = vld [vmem:[%s1411_s23] sm:$0x3]  ;;  %v1272_v46 = vpack.c.bf16 %v1029_v43, %v1028_v42  ;;  %v1015_v48 = vld [vmem:[%s1646_s2 + $0x58] sm:$0xff]  ;;  %v1030_v49 = vld [vmem:[%s1646_s2 + $0x70] sm:$0xff] }
  0x21   : > { %1136 = vmatmul.mubr.msk.f32.vlgmr.msra.gmra.mrb[0].mxu0 %vm238_vm2, %v1458_v19  ;;  %1225 = vmatpush3.bf16.msra.mxu1 %v1224_v20  ;;  %v1031_v50 = vld [vmem:[%s1646_s2 + $0x78] sm:$0xff]  ;;  %v1257_v51 = vpack.c.bf16 %v1015_v48, %v1014_v47  ;;  %v1004_v53 = vld [vmem:[%s1645_s1 + $0x80] sm:$0xff]  ;;  %v1005_v54 = vld [vmem:[%s1645_s1 + $0x88] sm:$0xff] }
  0x22   : > { %1243 = vmatpush3.bf16.msra.mxu0 %v1242_v21  ;;  %1226 = vmatprep.subr.bf16.mxu1 %v1358_v4  ;;  %v1275_v52 = vpack.c.bf16 %v1031_v50, %v1030_v49  ;;  %v1020_v55 = vld [vmem:[%s1645_s1 + $0xc0] sm:$0xff]  ;;  %v1021_v56 = vld [vmem:[%s1645_s1 + $0xc8] sm:$0xff]  ;;  %v1260_v57 = vpack.c.bf16 %v1005_v54, %v1004_v53  ;;  %v1006_v59 = vld [vmem:[%s1645_s1 + $0x90] sm:$0xff] }
  0x23   : > { %1244 = vmatprep.subr.bf16.mxu0 %v1358_v4  ;;  %1124 = vmatprep.mubr.msk.f32.mxu1 %vm1359_vm1, %v1360_v12  ;;  %v1278_v58 = vpack.c.bf16 %v1021_v56, %v1020_v55  ;;  %v1007_v60 = vld [vmem:[%s1645_s1 + $0x98] sm:$0xff]  ;;  %v1022_v61 = vld [vmem:[%s1645_s1 + $0xd0] sm:$0xff]  ;;  %v1008_v1 = vld [vmem:[%s1645_s1 + $0xa0] sm:$0xff] }
  0x24   : > { %1154 = vmatprep.mubr.msk.f32.mxu0 %vm1359_vm1, %v1360_v12  ;;  %v1023_v62 = vld [vmem:[%s1645_s1 + $0xd8] sm:$0xff]  ;;  %v1263_v63 = vpack.c.bf16 %v1007_v60, %v1006_v59  ;;  %v1009_v2 = vld [vmem:[%s1645_s1 + $0xa8] sm:$0xff]  ;;  %v1024_v3 = vld [vmem:[%s1645_s1 + $0xe0] sm:$0xff] }
  0x25   : > { %1228 = vmatpush3.bf16.msra.mxu1 %v1227_v26  ;;  %v1281_v0 = vpack.c.bf16 %v1023_v62, %v1022_v61  ;;  %v1025_v5 = vld [vmem:[%s1645_s1 + $0xe8] sm:$0xff]  ;;  %v1266_v6 = vpack.c.bf16 %v1009_v2, %v1008_v1  ;;  %v1010_v8 = vld [vmem:[%s1645_s1 + $0xb0] sm:$0xff]  ;;  %v1011_v9 = vld [vmem:[%s1645_s1 + $0xb8] sm:$0xff] }
  0x26   : > { %1246 = vmatpush3.bf16.msra.mxu0 %v1245_v27  ;;  %1229 = vmatprep.subr.bf16.mxu1 %v1358_v4  ;;  %v1284_v7 = vpack.c.bf16 %v1025_v5, %v1024_v3  ;;  %v1026_v10 = vld [vmem:[%s1645_s1 + $0xf0] sm:$0xff]  ;;  %v1027_v11 = vld [vmem:[%s1645_s1 + $0xf8] sm:$0xff]  ;;  %v1035_v41 = vld [vmem:[%s1647_s3 + $0x3] ss:$0 sm:$0xff] }
  0x27   : > { %1247 = vmatprep.subr.bf16.mxu0 %v1358_v4  ;;  %v1287_v13 = vpack.c.bf16 %v1027_v11, %v1026_v10  ;;  %v225_v49 = vld [vmem:[#allocation3] sm:$0x3] }
  0x29   : > { %1231 = vmatpush3.bf16.msra.mxu1 %v1230_v32 }
  0x2a   : > { %1249 = vmatpush3.bf16.msra.mxu0 %v1248_v33  ;;  %1232 = vmatprep.subr.bf16.mxu1 %v1358_v4 }
  0x2b   : > { %1250 = vmatprep.subr.bf16.mxu0 %v1358_v4 }
  0x2d   : > { %1234 = vmatpush3.bf16.msra.mxu1 %v1233_v38  ;;  %v1019_v38 = vld [vmem:[%s1647_s3 + $0x2] ss:$0 sm:$0xff] }
  0x2e   : > { %1252 = vmatpush3.bf16.msra.mxu0 %v1251_v39  ;;  %1253 = vmatprep.subr.bf16.mxu1 %v1358_v4 }
  0x2f   : > { %1271 = vmatprep.subr.bf16.mxu0 %v1358_v4 }
  0x30   : > { %1125 = vmatmul.mubr.msk.f32.vlgmr.msra.gmra.mrb[2].mxu1 %vm312_vm3, %v1525_v44 }
  0x31   : > { %1155 = vmatmul.mubr.msk.f32.vlgmr.msra.gmra.mrb[2].mxu0 %vm312_vm3, %v1525_v44  ;;  %1255 = vmatpush3.bf16.msra.mxu1 %v1254_v45 }
  0x32   : > { %1273 = vmatpush3.bf16.msra.mxu0 %v1272_v46  ;;  %1256 = vmatprep.subr.bf16.mxu1 %v1358_v4 }
  0x33   : > { %1274 = vmatprep.subr.bf16.mxu0 %v1358_v4  ;;  %1165 = vmatprep.mubr.msk.f32.mxu1 %vm1359_vm1, %v1360_v12 }
  0x34   : > { %1195 = vmatprep.mubr.msk.f32.mxu0 %vm1359_vm1, %v1360_v12 }
  0x35   : > { %1258 = vmatpush3.bf16.msra.mxu1 %v1257_v51 }
  0x36   : > { %1276 = vmatpush3.bf16.msra.mxu0 %v1275_v52  ;;  %1259 = vmatprep.subr.bf16.mxu1 %v1358_v4 }
  0x37   : > { %1277 = vmatprep.subr.bf16.mxu0 %v1358_v4 }
  0x38   : > { %1166 = vmatmul.mubr.msk.f32.vlgmr.msra.gmra.mrb[4].mxu1 %vm238_vm2, %v1458_v19 }
  0x39   : > { %1196 = vmatmul.mubr.msk.f32.vlgmr.msra.gmra.mrb[4].mxu0 %vm238_vm2, %v1458_v19  ;;  %1261 = vmatpush3.bf16.msra.mxu1 %v1260_v57  ;;  %v985_v19 = vld [vmem:[%s1647_s3] ss:$0 sm:$0xff] }
  0x3a   : > { %1279 = vmatpush3.bf16.msra.mxu0 %v1278_v58  ;;  %1262 = vmatprep.subr.bf16.mxu1 %v1358_v4 }
  0x3b   : > { %1280 = vmatprep.subr.bf16.mxu0 %v1358_v4  ;;  %1184 = vmatprep.mubr.msk.f32.mxu1 %vm1359_vm1, %v1360_v12 }
  0x3c   : > { %1214 = vmatprep.mubr.msk.f32.mxu0 %vm1359_vm1, %v1360_v12  ;;  %v1269_v12 = vpack.c.bf16 %v1011_v9, %v1010_v8 }
  0x3d   : > { %1264 = vmatpush3.bf16.msra.mxu1 %v1263_v63 }
  0x3e   : > { %1282 = vmatpush3.bf16.msra.mxu0 %v1281_v0  ;;  %1265 = vmatprep.subr.bf16.mxu1 %v1358_v4 }
  0x3f   : > { %1283 = vmatprep.subr.bf16.mxu0 %v1358_v4 }
  0x41   : > { %1267 = vmatpush3.bf16.msra.mxu1 %v1266_v6 }
  0x42   : > { %1285 = vmatpush3.bf16.msra.mxu0 %v1284_v7  ;;  %1268 = vmatprep.subr.bf16.mxu1 %v1358_v4 }
  0x43   : > { %1286 = vmatprep.subr.bf16.mxu0 %v1358_v4  ;;  %v1002_v4 = vld [vmem:[%s1647_s3 + $0x1] ss:$0 sm:$0xff] }
  0x45   : > { %1270 = vmatpush3.bf16.msra.mxu1 %v1269_v12 }
  0x46   : > { %1288 = vmatpush3.bf16.msra.mxu0 %v1287_v13 }
  0x48   : > { %1185 = vmatmul.mubr.msk.f32.vlgmr.msra.gmra.mrb[6].mxu1 %vm312_vm3, %v1525_v44 }
  0x49   : > { %1215 = vmatmul.mubr.msk.f32.vlgmr.msra.gmra.mrb[6].mxu0 %vm312_vm3, %v1525_v44 }
  0xf3   : > { %v308_v14 = vpop.f32.mrb[0].mxu1 }
  0xf4   : > { %v480_v15 = vpop.f32.mrb[0].mxu0  ;;  %v1107_v16 = vpop.f32.mrb[1].mxu1 }
  0xf5   : > { %v1137_v17 = vpop.f32.mrb[1].mxu0 }
 0x103   : > { %v382_v18 = vpop.f32.mrb[2].mxu1 }
 0x104   : > { %v383_v20 = vadd.f32 %v382_v18, %v308_v14  ;;  %v550_v21 = vpop.f32.mrb[2].mxu0  ;;  %v1126_v22 = vpop.f32.mrb[3].mxu1 }
 0x105   : > { %v551_v23 = vadd.f32 %v550_v21, %v480_v15  ;;  %v1156_v24 = vpop.f32.mrb[3].mxu0 }
 0x106   : > { %v393_v25 = vadd.f32 %v985_v19, %v383_v20 }
 0x107   : > { %v562_v26 = vadd.f32 %v1002_v4, %v551_v23 }
 0x108   : > { %v986_v28 = vmul.f32 -1.442695, %v393_v25 }
 0x109   : > { %v1003_v27 = vmul.f32 -1.442695, %v562_v26 }
 0x10b   : > { %v649_v29 = vpop.f32.mrb[4].mxu1  ;;  %1317 = vpow2.f32 %v1003_v27 }
 0x10c   : > { %v813_v30 = vpop.f32.mrb[4].mxu0  ;;  %v1167_v31 = vpop.f32.mrb[5].mxu1  ;;  %1319 = vpow2.f32 %v986_v28 }
 0x10d   : > { %v1197_v32 = vpop.f32.mrb[5].mxu0 }
 0x115   : > { %v1318_v33 = vpop.eup %1317 }
 0x116   : > { %v1320_v34 = vpop.eup %1319  ;;  %v566_v35 = vadd.f32 1.0, %v1318_v33 }
 0x117   : > { %v397_v36 = vadd.f32 1.0, %v1320_v34 }
 0x118   : > { %1321 = vrcp.f32 %v566_v35 }
 0x119   : > { %1323 = vrcp.f32 %v397_v36 }
 0x11b   : > { %v719_v37 = vpop.f32.mrb[6].mxu1 }
 0x11c   : > { %v720_v39 = vadd.f32 %v719_v37, %v649_v29  ;;  %v883_v40 = vpop.f32.mrb[6].mxu0  ;;  %v1186_v42 = vpop.f32.mrb[7].mxu1 }
 0x11d   : > { %v884_v43 = vadd.f32 %v883_v40, %v813_v30  ;;  %v1216_v44 = vpop.f32.mrb[7].mxu0 }
 0x11e   : > { %v731_v45 = vadd.f32 %v1019_v38, %v720_v39 }
 0x11f   : > { %v895_v46 = vadd.f32 %v1035_v41, %v884_v43 }
 0x120   : > { %1325 = vtanh.f32 %v731_v45 }
 0x121   : > { %v1036_v47 = vmul.f32 -1.442695, %v895_v46 }
 0x122   : > { %v1322_v48 = vpop.eup %1321 }
 0x123   : > { %1327 = vpow2.f32 %v1036_v47  ;;  %v1324_v50 = vpop.eup %1323  ;;  %v902_v52 = vmul.f32 %v1322_v48, %v225_v49 }
 0x12a   : > { %v1326_v51 = vpop.eup %1325 }
 0x12b   : > { %v903_v53 = vmul.f32 %v1326_v51, %v1324_v50 }
 0x12d   : > { %v1328_v54 = vpop.eup %1327  ;;  %v904_v55 = vadd.f32 %v903_v53, %v902_v52 }
 0x12e   : > { %v899_v56 = vadd.f32 1.0, %v1328_v54 }
 0x12f   : > { %1329 = vtanh.f32 %v904_v55  ;;  %909 = vst.msk [vmem:[#allocation3] sm:$0x3] %vm907_vm4, %v904_v55 }
 0x130   : > { %1331 = vrcp.f32 %v899_v56 }
 0x137   : > { %913 = sbr.rel (%p1037_p6) target bundleno = 318 (0x13e), region = 44 }
 0x139   : > { %v1330_v57 = vpop.eup %1329 }
 0x13a   : > { %v1332_v58 = vpop.eup %1331 }
 0x13b   : > { %v906_v59 = vmul.f32 %v1332_v58, %v1330_v57 }
 0x13d   : > { %908 = vst.msk [vmem:[#allocation2] sm:$0x3] %vm907_vm4, %v906_v59  ;;  %914 = vst.msk [vmem:[%s1648_s4] sm:$0x3] (!%p1037_p6), %vm907_vm4, %v906_v59 }
 0x13e PF: > { %s14_s17 = sadd.s32 1, %s1355_s17   ;;  %s1649_s15 = smov %s1351_s16 }
 0x13f   : > { %p11_p7 = scmp.ge.s32.totalorder %s14_s17, 6   ;;  %s1650_s16 = smov %s1652_s18 }
 0x141   :  { %13 = sbr.rel (!%p11_p7) target bundleno = 2 (0x2), region = 83 }

</bundles_post_ra>
